<compile_context>
chip_gen: v7x
topology: tpu7x:2x2x1
jax: 0.10.0
libtpu: 0.0.40
codegen_flags: <defaults>
</compile_context>

<pallas_src>
import functools

import jax
import jax.numpy as jnp
from jax.experimental import pallas as pl
from jax.experimental.pallas import tpu as pltpu


def _decoder_kernel(gap_ref, patches_ref, w_os_ref, b_os_ref,
                    w_rel_ref, b_rel_ref, w2t_ref, eff_scale_ref, eff_bias_ref,
                    y_ref, rel_ref, oselm_ref, *, kk):
    """Per-batch fused Decoder forward (one grid step == one batch element)."""
    gap = gap_ref[0]                                      # (1, Cin)  f32

    # Placeholder OSELM / Relation heads: GAP -> dense -> tanh (per-channel).
    oselm = jnp.tanh(
        jnp.dot(gap, w_os_ref[...], preferred_element_type=jnp.float32)
        + b_os_ref[...])                                  # (1, Cin)
    rel = jnp.tanh(
        jnp.dot(gap, w_rel_ref[...], preferred_element_type=jnp.float32)
        + b_rel_ref[...])                                 # (1, Cin)

    # Wfusion = 0.1*oselm + relation + 1  (per-input-channel scale of x).
    wfusion = 0.1 * oselm + rel + 1.0                     # (1, Cin)

    # Fold the per-channel scale into the conv weight instead of the patches:
    # (P diag(s)) W == P (diag(s) W).  K is ordered (kh, kw, c) with c fastest,
    # so the K-axis scale is wfusion tiled kk times.
    scale_k = jnp.tile(wfusion, (1, kk))                  # (1, K)
    w2t_s = (w2t_ref[...] * scale_k).astype(jnp.bfloat16)  # (Cout, K)

    # Lane-dense GEMM: (Cout, K) @ (K, Ho*Wo) -> (Cout, Ho*Wo), f32 accumulate.
    acc = jnp.dot(w2t_s, patches_ref[0],
                  preferred_element_type=jnp.float32)

    # conv bias + BatchNorm2d (eval, running stats) folded into scale/bias.
    y = acc * eff_scale_ref[...] + eff_bias_ref[...]      # f32 epilogue
    y = jnp.maximum(y, 0.0)                               # ReLU
    # nn.Dropout: eval mode == identity (no-op here)

    y_ref[0] = y.astype(y_ref.dtype)
    rel_ref[0] = rel
    oselm_ref[0] = oselm


def init_params(key, nchannels, noutputs, kh=4, kw=4):
    ks = jax.random.split(key, 8)
    p = {
        "w_oselm": 0.5 * jax.random.normal(ks[0], (nchannels, nchannels), jnp.float32),
        "b_oselm": 0.1 * jax.random.normal(ks[1], (1, nchannels), jnp.float32),
        "w_rel":   0.5 * jax.random.normal(ks[2], (nchannels, nchannels), jnp.float32),
        "b_rel":   0.1 * jax.random.normal(ks[3], (1, nchannels), jnp.float32),
        # Conv2d(nchannels, noutputs, 4) weight in HWIO layout + bias
        "conv_w":  0.1 * jax.random.normal(ks[4], (kh, kw, nchannels, noutputs), jnp.float32),
        "conv_b":  0.05 * jax.random.normal(ks[5], (noutputs,), jnp.float32),
        # BatchNorm2d(noutputs) — eval mode running stats + affine
        "bn_gamma": 1.0 + 0.1 * jax.random.normal(ks[6], (noutputs,), jnp.float32),
        "bn_beta":  0.1 * jax.random.normal(ks[7], (noutputs,), jnp.float32),
        "bn_mean":  jnp.zeros((noutputs,), jnp.float32),
        "bn_var":   jnp.ones((noutputs,), jnp.float32),
    }
    return p


def decoder_forward(x_nchw, params):
    B, Cin, H, W = x_nchw.shape
    KH = KW = 4
    Ho, Wo = H - KH + 1, W - KW + 1
    Cout = params["conv_w"].shape[-1]
    K = KH * KW * Cin
    Nsp = Ho * Wo

    # ---- glue: layout transforms ----
    x = jnp.transpose(x_nchw, (0, 2, 3, 1))               # NHWC, f32
    # GAP in the wrapper (fuses with the transpose); kernel gets (B, 1, Cin).
    gap = jnp.mean(x, axis=(1, 2)).reshape(B, 1, Cin)

    # im2col with K on sublanes and spatial on lanes: (B, K, Ho*Wo), K ordered
    # (kh, kw, c) c-fastest to match conv_w.reshape below.
    # TODO(synk): for production sizes, accumulate the 16 (kh,kw) taps inside
    # the kernel instead of materializing the 16x im2col expansion in HBM.
    cols = []
    for kh in range(KH):
        for kw in range(KW):
            cols.append(x[:, kh:kh + Ho, kw:kw + Wo, :])
    patches = jnp.stack(cols, axis=3)                     # (B, Ho, Wo, 16, Cin)
    patches = jnp.transpose(patches, (0, 3, 4, 1, 2)).reshape(B, K, Nsp)
    patches = patches.astype(jnp.bfloat16)                # bf16 MXU operand

    # Conv weight as (Cout, K): y = W_t @ patches  (lane-dense output).
    w2t = jnp.transpose(params["conv_w"].reshape(K, Cout), (1, 0))

    eps = 1e-5
    eff_scale = params["bn_gamma"] * jax.lax.rsqrt(params["bn_var"] + eps)
    eff_bias = params["bn_beta"] + (params["conv_b"] - params["bn_mean"]) * eff_scale
    eff_scale = eff_scale.reshape(Cout, 1)
    eff_bias = eff_bias.reshape(Cout, 1)

    kernel = functools.partial(_decoder_kernel, kk=KH * KW)

    out_shapes = (
        jax.ShapeDtypeStruct((B, Cout, Nsp), jnp.float32),   # conv+bn+relu (NC,HW)
        jax.ShapeDtypeStruct((B, 1, Cin), jnp.float32),      # relation
        jax.ShapeDtypeStruct((B, 1, Cin), jnp.float32),      # oselm
    )
    grid_spec = pltpu.PrefetchScalarGridSpec(
        num_scalar_prefetch=0,
        grid=(B,),
        in_specs=[
            pl.BlockSpec((1, 1, Cin), lambda b: (b, 0, 0)),      # gap
            pl.BlockSpec((1, K, Nsp), lambda b: (b, 0, 0)),      # patches (bf16)
            pl.BlockSpec((Cin, Cin), lambda b: (0, 0)),          # w_oselm
            pl.BlockSpec((1, Cin), lambda b: (0, 0)),            # b_oselm
            pl.BlockSpec((Cin, Cin), lambda b: (0, 0)),          # w_rel
            pl.BlockSpec((1, Cin), lambda b: (0, 0)),            # b_rel
            pl.BlockSpec((Cout, K), lambda b: (0, 0)),           # conv weight (Cout, K)
            pl.BlockSpec((Cout, 1), lambda b: (0, 0)),           # eff_scale
            pl.BlockSpec((Cout, 1), lambda b: (0, 0)),           # eff_bias
        ],
        out_specs=(
            pl.BlockSpec((1, Cout, Nsp), lambda b: (b, 0, 0)),
            pl.BlockSpec((1, 1, Cin), lambda b: (b, 0, 0)),
            pl.BlockSpec((1, 1, Cin), lambda b: (b, 0, 0)),
        ),
    )

    y, rel, oselm = pl.pallas_call(
        kernel,
        out_shape=out_shapes,
        grid_spec=grid_spec,
        # Batch axis parallel -> v7x's two TensorCores split the grid; no-op on
        # v5e/v6e. Working set per step is ~O(100 KB), well under VMEM limits.
        compiler_params=pltpu.CompilerParams(dimension_semantics=("parallel",)),
    )(gap, patches, params["w_oselm"], params["b_oselm"],
      params["w_rel"], params["b_rel"], w2t, eff_scale, eff_bias)

    # ---- glue: nearest x4 upsample (output is already NCHW) ----
    y = y.reshape(B, Cout, Ho, Wo)
    y = jnp.repeat(jnp.repeat(y, 4, axis=2), 4, axis=3)
    return y, rel.reshape(B, Cin), oselm.reshape(B, Cin)


def reference_forward(x_nchw, params):
    """Pure-JAX f32 reference of the same semantics (for a sanity check)."""
    B, Cin, H, W = x_nchw.shape
    x = jnp.transpose(x_nchw, (0, 2, 3, 1))
    gap = jnp.mean(x, axis=(1, 2))
    oselm = jnp.tanh(gap @ params["w_oselm"] + params["b_oselm"][0])
    rel = jnp.tanh(gap @ params["w_rel"] + params["b_rel"][0])
    wf = 0.1 * oselm + rel + 1.0
    xs = x * wf[:, None, None, :]
    y = jax.lax.conv_general_dilated(
        xs, params["conv_w"], window_strides=(1, 1), padding="VALID",
        dimension_numbers=("NHWC", "HWIO", "NHWC"))
    y = y + params["conv_b"]
    eps = 1e-5
    y = (y - params["bn_mean"]) * params["bn_gamma"] * jax.lax.rsqrt(
        params["bn_var"] + eps) + params["bn_beta"]
    y = jnp.maximum(y, 0.0)
    y = jnp.repeat(jnp.repeat(y, 4, axis=1), 4, axis=2)
    return jnp.transpose(y, (0, 3, 1, 2)), rel, oselm


if __name__ == "__main__":
    B, Cin, H, W = 2, 4, 16, 16
    Cout = 8

    key = jax.random.PRNGKey(0)
    kx, kp = jax.random.split(key)
    x = jax.random.normal(kx, (B, Cin, H, W), jnp.float32)
    params = init_params(kp, nchannels=Cin, noutputs=Cout)

    out, rel, oselm = decoder_forward(x, params)
    out = jax.block_until_ready(out)
    rel = jax.block_until_ready(rel)
    oselm = jax.block_until_ready(oselm)

    assert out.shape == (B, Cout, (H - 3) * 4, (W - 3) * 4), out.shape
    assert rel.shape == (B, Cin) and oselm.shape == (B, Cin)
    assert bool(jnp.all(jnp.isfinite(out)))

    ref_out, ref_rel, ref_oselm = reference_forward(x, params)
    # Heads run fully in f32 -> tight tolerance; main GEMM is bf16-in/f32-acc.
    assert jnp.allclose(rel, ref_rel, atol=1e-4, rtol=1e-4)
    assert jnp.allclose(oselm, ref_oselm, atol=1e-4, rtol=1e-4)
    assert jnp.allclose(out, ref_out, atol=3e-2, rtol=3e-2)

    print("KERNEL_OK")
</pallas_src>

<mosaic_0001>
module attributes {stable_mosaic.version = 11 : i64} {
  func.func @_decoder_kernel(%arg0: i32, %arg1: memref<1x1x4xf32, #tpu.memory_space<vmem>>, %arg2: memref<1x64x169xbf16, #tpu.memory_space<vmem>>, %arg3: memref<4x4xf32, #tpu.memory_space<vmem>>, %arg4: memref<1x4xf32, #tpu.memory_space<vmem>>, %arg5: memref<4x4xf32, #tpu.memory_space<vmem>>, %arg6: memref<1x4xf32, #tpu.memory_space<vmem>>, %arg7: memref<8x64xf32, #tpu.memory_space<vmem>>, %arg8: memref<8x1xf32, #tpu.memory_space<vmem>>, %arg9: memref<8x1xf32, #tpu.memory_space<vmem>>, %arg10: memref<1x8x169xf32, #tpu.memory_space<vmem>>, %arg11: memref<1x1x4xf32, #tpu.memory_space<vmem>>, %arg12: memref<1x1x4xf32, #tpu.memory_space<vmem>>) attributes {dimension_semantics = [#tpu.dimension_semantics<parallel>], iteration_bounds = array<i64: 2>, scalar_prefetch = 0 : i64, scratch_operands = 0 : i64, tpu.core_type = #tpu.core_type<tc>, window_params = [{transform_indices = @transform_0, window_bounds = array<i64: 1, 1, 4>}, {transform_indices = @transform_1, window_bounds = array<i64: 1, 64, 169>}, {pipeline_mode = #tpu.pipeline_mode<synchronous>, transform_indices = @transform_2, window_bounds = array<i64: 4, 4>}, {pipeline_mode = #tpu.pipeline_mode<synchronous>, transform_indices = @transform_3, window_bounds = array<i64: 1, 4>}, {pipeline_mode = #tpu.pipeline_mode<synchronous>, transform_indices = @transform_4, window_bounds = array<i64: 4, 4>}, {pipeline_mode = #tpu.pipeline_mode<synchronous>, transform_indices = @transform_5, window_bounds = array<i64: 1, 4>}, {pipeline_mode = #tpu.pipeline_mode<synchronous>, transform_indices = @transform_6, window_bounds = array<i64: 8, 64>}, {pipeline_mode = #tpu.pipeline_mode<synchronous>, transform_indices = @transform_7, window_bounds = array<i64: 8, 1>}, {pipeline_mode = #tpu.pipeline_mode<synchronous>, transform_indices = @transform_8, window_bounds = array<i64: 8, 1>}, {transform_indices = @transform_9, window_bounds = array<i64: 1, 8, 169>}, {transform_indices = @transform_10, window_bounds = array<i64: 1, 1, 4>}, {transform_indices = @transform_11, window_bounds = array<i64: 1, 1, 4>}]} {
    %c0 = arith.constant 0 : index
    %c0_0 = arith.constant 0 : index
    %c0_1 = arith.constant 0 : index
    %0 = vector.load %arg1[%c0, %c0_0, %c0_1] : memref<1x1x4xf32, #tpu.memory_space<vmem>>, vector<1x1x4xf32>
    %1 = vector.shape_cast %0 : vector<1x1x4xf32> to vector<1x4xf32>
    %c0_2 = arith.constant 0 : index
    %c0_3 = arith.constant 0 : index
    %2 = vector.load %arg3[%c0_2, %c0_3] : memref<4x4xf32, #tpu.memory_space<vmem>>, vector<4x4xf32>
    %cst = arith.constant dense<0.000000e+00> : vector<1x4xf32>
    %3 = tpu.matmul %1, %2, %cst {dimension_numbers = #tpu.dot_dimension_numbers<[1], [0], [0], [1], [0, 0, 1, 1], [], []>} : vector<1x4xf32>, vector<4x4xf32>, vector<1x4xf32> -> vector<1x4xf32>
    %c0_4 = arith.constant 0 : index
    %c0_5 = arith.constant 0 : index
    %4 = vector.load %arg4[%c0_4, %c0_5] : memref<1x4xf32, #tpu.memory_space<vmem>>, vector<1x4xf32>
    %5 = arith.addf %3, %4 : vector<1x4xf32>
    %6 = math.tanh %5 : vector<1x4xf32>
    %c0_6 = arith.constant 0 : index
    %c0_7 = arith.constant 0 : index
    %7 = vector.load %arg5[%c0_6, %c0_7] : memref<4x4xf32, #tpu.memory_space<vmem>>, vector<4x4xf32>
    %cst_8 = arith.constant dense<0.000000e+00> : vector<1x4xf32>
    %8 = tpu.matmul %1, %7, %cst_8 {dimension_numbers = #tpu.dot_dimension_numbers<[1], [0], [0], [1], [0, 0, 1, 1], [], []>} : vector<1x4xf32>, vector<4x4xf32>, vector<1x4xf32> -> vector<1x4xf32>
    %c0_9 = arith.constant 0 : index
    %c0_10 = arith.constant 0 : index
    %9 = vector.load %arg6[%c0_9, %c0_10] : memref<1x4xf32, #tpu.memory_space<vmem>>, vector<1x4xf32>
    %10 = arith.addf %8, %9 : vector<1x4xf32>
    %11 = math.tanh %10 : vector<1x4xf32>
    %cst_11 = arith.constant 1.000000e-01 : f32
    %12 = vector.broadcast %cst_11 : f32 to vector<1x4xf32>
    %13 = arith.mulf %12, %6 : vector<1x4xf32>
    %14 = arith.addf %13, %11 : vector<1x4xf32>
    %cst_12 = arith.constant 1.000000e+00 : f32
    %15 = vector.broadcast %cst_12 : f32 to vector<1x4xf32>
    %16 = arith.addf %14, %15 : vector<1x4xf32>
    %17 = tpu.concatenate %16, %16, %16, %16, %16, %16, %16, %16, %16, %16, %16, %16, %16, %16, %16, %16 in 1 : vector<1x4xf32>, vector<1x4xf32>, vector<1x4xf32>, vector<1x4xf32>, vector<1x4xf32>, vector<1x4xf32>, vector<1x4xf32>, vector<1x4xf32>, vector<1x4xf32>, vector<1x4xf32>, vector<1x4xf32>, vector<1x4xf32>, vector<1x4xf32>, vector<1x4xf32>, vector<1x4xf32>, vector<1x4xf32> -> vector<1x64xf32>
    %c0_13 = arith.constant 0 : index
    %c0_14 = arith.constant 0 : index
    %18 = vector.load %arg7[%c0_13, %c0_14] : memref<8x64xf32, #tpu.memory_space<vmem>>, vector<8x64xf32>
    %19 = vector.broadcast %17 : vector<1x64xf32> to vector<8x64xf32>
    %20 = arith.mulf %18, %19 : vector<8x64xf32>
    %21 = arith.truncf %20 : vector<8x64xf32> to vector<8x64xbf16>
    %c0_15 = arith.constant 0 : index
    %c0_16 = arith.constant 0 : index
    %c0_17 = arith.constant 0 : index
    %22 = vector.load %arg2[%c0_15, %c0_16, %c0_17] : memref<1x64x169xbf16, #tpu.memory_space<vmem>>, vector<1x64x169xbf16>
    %23 = vector.shape_cast %22 : vector<1x64x169xbf16> to vector<64x169xbf16>
    %cst_18 = arith.constant dense<0.000000e+00> : vector<8x169xf32>
    %24 = tpu.matmul %21, %23, %cst_18 {dimension_numbers = #tpu.dot_dimension_numbers<[1], [0], [0], [1], [0, 0, 1, 1], [], []>} : vector<8x64xbf16>, vector<64x169xbf16>, vector<8x169xf32> -> vector<8x169xf32>
    %c0_19 = arith.constant 0 : index
    %c0_20 = arith.constant 0 : index
    %25 = vector.load %arg8[%c0_19, %c0_20] : memref<8x1xf32, #tpu.memory_space<vmem>>, vector<8x1xf32>
    %26 = vector.broadcast %25 : vector<8x1xf32> to vector<8x169xf32>
    %27 = arith.mulf %24, %26 : vector<8x169xf32>
    %c0_21 = arith.constant 0 : index
    %c0_22 = arith.constant 0 : index
    %28 = vector.load %arg9[%c0_21, %c0_22] : memref<8x1xf32, #tpu.memory_space<vmem>>, vector<8x1xf32>
    %29 = vector.broadcast %28 : vector<8x1xf32> to vector<8x169xf32>
    %30 = arith.addf %27, %29 : vector<8x169xf32>
    %cst_23 = arith.constant 0.000000e+00 : f32
    %31 = vector.broadcast %cst_23 : f32 to vector<8x169xf32>
    %32 = arith.maximumf %30, %31 : vector<8x169xf32>
    %c0_24 = arith.constant 0 : index
    %c0_25 = arith.constant 0 : index
    %c0_26 = arith.constant 0 : index
    %33 = vector.load %arg10[%c0_24, %c0_25, %c0_26] : memref<1x8x169xf32, #tpu.memory_space<vmem>>, vector<1x8x169xf32>
    %34 = vector.shape_cast %33 : vector<1x8x169xf32> to vector<8x169xf32>
    %35 = vector.shape_cast %32 : vector<8x169xf32> to vector<1x8x169xf32>
    tpu.vector_store %arg10[%c0_24, %c0_25, %c0_26], %35 {strides = array<i32>} : memref<1x8x169xf32, #tpu.memory_space<vmem>>, vector<1x8x169xf32>,
    %c0_27 = arith.constant 0 : index
    %c0_28 = arith.constant 0 : index
    %c0_29 = arith.constant 0 : index
    %36 = vector.load %arg11[%c0_27, %c0_28, %c0_29] : memref<1x1x4xf32, #tpu.memory_space<vmem>>, vector<1x1x4xf32>
    %37 = vector.shape_cast %36 : vector<1x1x4xf32> to vector<1x4xf32>
    %38 = vector.shape_cast %11 : vector<1x4xf32> to vector<1x1x4xf32>
    tpu.vector_store %arg11[%c0_27, %c0_28, %c0_29], %38 {strides = array<i32>} : memref<1x1x4xf32, #tpu.memory_space<vmem>>, vector<1x1x4xf32>,
    %c0_30 = arith.constant 0 : index
    %c0_31 = arith.constant 0 : index
    %c0_32 = arith.constant 0 : index
    %39 = vector.load %arg12[%c0_30, %c0_31, %c0_32] : memref<1x1x4xf32, #tpu.memory_space<vmem>>, vector<1x1x4xf32>
    %40 = vector.shape_cast %39 : vector<1x1x4xf32> to vector<1x4xf32>
    %41 = vector.shape_cast %6 : vector<1x4xf32> to vector<1x1x4xf32>
    tpu.vector_store %arg12[%c0_30, %c0_31, %c0_32], %41 {strides = array<i32>} : memref<1x1x4xf32, #tpu.memory_space<vmem>>, vector<1x1x4xf32>,
    return
  }
  func.func @transform_0(%arg0: i32) -> (i32, i32, i32) {
    %c0_i32 = arith.constant 0 : i32
    %c0_i32_0 = arith.constant 0 : i32
    %c0_i32_1 = arith.constant 0 : i32
    return %arg0, %c0_i32, %c0_i32_0 : i32, i32, i32
  }
  func.func @transform_1(%arg0: i32) -> (i32, i32, i32) {
    %c0_i32 = arith.constant 0 : i32
    %c0_i32_0 = arith.constant 0 : i32
    %c0_i32_1 = arith.constant 0 : i32
    return %arg0, %c0_i32, %c0_i32_0 : i32, i32, i32
  }
  func.func @transform_2(%arg0: i32) -> (i32, i32) {
    %c0_i32 = arith.constant 0 : i32
    %c0_i32_0 = arith.constant 0 : i32
    %c0_i32_1 = arith.constant 0 : i32
    return %c0_i32, %c0_i32_0 : i32, i32
  }
  func.func @transform_3(%arg0: i32) -> (i32, i32) {
    %c0_i32 = arith.constant 0 : i32
    %c0_i32_0 = arith.constant 0 : i32
    %c0_i32_1 = arith.constant 0 : i32
    return %c0_i32, %c0_i32_0 : i32, i32
  }
  func.func @transform_4(%arg0: i32) -> (i32, i32) {
    %c0_i32 = arith.constant 0 : i32
    %c0_i32_0 = arith.constant 0 : i32
    %c0_i32_1 = arith.constant 0 : i32
    return %c0_i32, %c0_i32_0 : i32, i32
  }
  func.func @transform_5(%arg0: i32) -> (i32, i32) {
    %c0_i32 = arith.constant 0 : i32
    %c0_i32_0 = arith.constant 0 : i32
    %c0_i32_1 = arith.constant 0 : i32
    return %c0_i32, %c0_i32_0 : i32, i32
  }
  func.func @transform_6(%arg0: i32) -> (i32, i32) {
    %c0_i32 = arith.constant 0 : i32
    %c0_i32_0 = arith.constant 0 : i32
    %c0_i32_1 = arith.constant 0 : i32
    return %c0_i32, %c0_i32_0 : i32, i32
  }
  func.func @transform_7(%arg0: i32) -> (i32, i32) {
    %c0_i32 = arith.constant 0 : i32
    %c0_i32_0 = arith.constant 0 : i32
    %c0_i32_1 = arith.constant 0 : i32
    return %c0_i32, %c0_i32_0 : i32, i32
  }
  func.func @transform_8(%arg0: i32) -> (i32, i32) {
    %c0_i32 = arith.constant 0 : i32
    %c0_i32_0 = arith.constant 0 : i32
    %c0_i32_1 = arith.constant 0 : i32
    return %c0_i32, %c0_i32_0 : i32, i32
  }
  func.func @transform_9(%arg0: i32) -> (i32, i32, i32) {
    %c0_i32 = arith.constant 0 : i32
    %c0_i32_0 = arith.constant 0 : i32
    %c0_i32_1 = arith.constant 0 : i32
    return %arg0, %c0_i32, %c0_i32_0 : i32, i32, i32
  }
  func.func @transform_10(%arg0: i32) -> (i32, i32, i32) {
    %c0_i32 = arith.constant 0 : i32
    %c0_i32_0 = arith.constant 0 : i32
    %c0_i32_1 = arith.constant 0 : i32
    return %arg0, %c0_i32, %c0_i32_0 : i32, i32, i32
  }
  func.func @transform_11(%arg0: i32) -> (i32, i32, i32) {
    %c0_i32 = arith.constant 0 : i32
    %c0_i32_0 = arith.constant 0 : i32
    %c0_i32_1 = arith.constant 0 : i32
    return %arg0, %c0_i32, %c0_i32_0 : i32, i32, i32
  }
}

</mosaic_0001>

<bundles_post_ra>
// kernel: tpu_custom_call.1
= control target key start
LH: loop header
LB: loop body
LE: loop exit
PB: predicated region body
PF: predicated region fallthrough
CT: control target
= control target key end

     0   :  { %s1626_s0 = inlined_call_operand.vmem [shape: f32[2,1,4], index: 0, kind: input, shape index: {}]   ;;  %s1627_s1 = inlined_call_operand.hbm [shape: bf16[2,64,169], index: 1, kind: input, shape index: {}]   ;;  %s1628_s2 = inlined_call_operand.vmem [shape: f32[4,4], index: 2, kind: input, shape index: {}]   ;;  %s1629_s3 = inlined_call_operand.vmem [shape: f32[1,4], index: 3, kind: input, shape index: {}]   ;;  %s1630_s4 = inlined_call_operand.vmem [shape: f32[4,4], index: 4, kind: input, shape index: {}]   ;;  %s1631_s5 = inlined_call_operand.vmem [shape: f32[1,4], index: 5, kind: input, shape index: {}]   ;;  %s1632_s6 = inlined_call_operand.vmem [shape: f32[8,64], index: 6, kind: input, shape index: {}]   ;;  %s1633_s7 = inlined_call_operand.vmem [shape: f32[8,1], index: 7, kind: input, shape index: {}]   ;;  %s1634_s8 = inlined_call_operand.vmem [shape: f32[8,1], index: 8, kind: input, shape index: {}]   ;;  %s1635_s9 = inlined_call_operand.hbm [shape: f32[2,8,169], index: 9, kind: output, shape index: {0}]   ;;  %s1636_s10 = inlined_call_operand.hbm [shape: f32[2,1,4], index: 10, kind: output, shape index: {1}]   ;;  %s1637_s11 = inlined_call_operand.hbm [shape: f32[2,1,4], index: 11, kind: output, shape index: {2}]  }
   0x1   :  { %1642 = sst [smem:[#allocation14_spill]] %s1626_s0 }
   0x2   :  { %1643 = sst [smem:[#allocation15_spill]] %s1627_s1 }
   0x3   :  { %17 = vsyncpa [#allocation3], 0 }
   0x4   :  { %19 = vsyncpa [#allocation3 + $0x1], 0 }
   0x5   :  { %20 = vsyncpa [#allocation4], 0 }
   0x6   :  { %22 = vsyncpa [#allocation4 + $0x1], 0 }
   0x7   :  { %23 = vsyncpa [#allocation7], 0 }
   0x8   :  { %25 = vsyncpa [#allocation7 + $0x1], 0  ;;  %s1358_s17 = smov 0   ;;  %s1360_s18 = smov 0  }
   0x9   :  { %s1362_s19 = smov 0   ;;  %s1364_s20 = smov 0  }
   0xa LB: > { %1644 = sst [smem:[#allocation12_spill]] %s1268_s19  ;;  %s1379_s21 = sadd.s32 4294967295, %s1272_s20   ;;  %s1272_s20 = sphi %s1364_s20, %s1662_s20   ;;  %s1268_s19 = sphi %s1362_s19, %s1659_s19   ;;  %s1264_s18 = sphi %s1360_s18, %s1661_s18   ;;  %s1260_s17 = sphi %s1358_s17, %s1660_s17  }
   0xb   : > { %s1638_s22 = sadd.s32 4294967294, %s1272_s20   ;;  %s1383_s23 = sadd.s32 1, %s1272_s20  }
   0xc   : > { %s64_s24 = sadd.s32 1, %s1268_s19  ;;  %s61_s25 = ssub.s32 %s1272_s20, %s1383_s23 }
   0xd   : > { %p71_p0 = scmp.ne.s32.totalorder %s1268_s19, %s1264_s18  ;;  %p62_p1 = scmp.eq.s32.totalorder %s61_s25, 0 }
   0xe   : > { %p72_p2 = scmp.eq.s32.totalorder %s1272_s20, 0  ;;  %p77_p3 = scmp.ne.s32.totalorder %s1264_s18, %s1260_s17 }
   0xf   : > { %p78_p4 = scmp.eq.s32.totalorder %s1379_s21, 0  ;;  %p248_p7 = scmp.eq.s32.totalorder %s1379_s21, 1 }
  0x10   : > { %s1395_s26 = scalar_select %p62_p1, %s1268_s19, %s64_s24  }
  0x11   : > { %p1397_p5 = por %p72_p2, %p71_p0  ;;  %p1401_p6 = por %p78_p4, %p77_p3 }
  0x12   : > { %1645 = sst [smem:[#allocation13_spill]] %s1395_s26  ;;  %p254_p8 = scmp.eq.s32.totalorder %s1638_s22, 1 }
  0x13   : > { %p1044_p10 = scmp.lt.s32.totalorder %s1272_s20, 2  ;;  %p1410_p11 = por %p248_p7, %p71_p0 }
  0x14   : > { %p1414_p12 = por %p254_p8, %p77_p3  ;;  %s353_s12 = sand.u32 1, %s1268_s19  }
  0x15   : > { %s1648_s29 = scalar_select %p1410_p11, 1, 0 }
  0x16   : > { %s1649_s30 = scalar_select %p1414_p12, 1, 0 }
  0x17   : > { %s1006_s13 = sshll.u32 %s1272_s20, 10  ;;  %s980_s14 = sshll.u32 %s353_s12, 6 }
  0x18   : > { %s1650_s1 = sld [smem:[#allocation15_spill]]  ;;  %s357_s25 = scalar_lea.vmem [#allocation2], %s980_s14 }
  0x19   : > { %s364_s22 = sshll.u32 %s357_s25, 4  ;;  %p1427_p13 = pnand %p1044_p10, %p1397_p5  ;;  %s1431_s22 = int_to_ptr.vmem [resolvable:$true] %s364_s22 }
  0x1a   : > { %s1433_s19 = scalar_lea.sflag [#allocation3], %s353_s12 }
  0x1b   : > { %p1118_p1 = pneg %p1427_p13 }
  0x1e   : > { %s1423_s24 = scalar_lea.hbm %s1650_s1, %s1006_s13  ;;  %s1121_s14 = scalar_lea.hbm %s1650_s1, 2048 }
  0x1f   : > { %s1116_s15 = scalar_lea.hbm %s1423_s24, 1024  ;;  %p1122_p4 = scmp.lt.u32.totalorder %s1423_s24, %s1650_s1 }
  0x20   : > { %p1117_p0 = scmp.ne.s32.totalorder %s1423_s24, %s1116_s15  ;;  %p1123_p5 = scmp.lt.u32.totalorder %s1121_s14, %s1116_s15 }
  0x21   : > { %p1125_p8 = scmp.lt.u32.totalorder %s1116_s15, %s1423_s24 }
  0x22   : > { %p1119_p2 = pnand %p1118_p1, %p1117_p0  ;;  %p1124_p7 = por %p1123_p5, %p1122_p4 }
  0x24   : > { %p1120_p3 = pneg %p1119_p2  ;;  %p1126_p10 = por %p1125_p8, %p1124_p7 }
  0x26   : > { %p1127_p9 = pnand %p1126_p10, %p1120_p3 }
  0x28   : > { %1130 = shalt.err (!%p1127_p9)
}
  0x29   : > { %s1131_s12 = scalar_lea.vmem %s1431_s22, 1024  ;;  %s1274_s13 = smov [#allocation2]  }
  0x2a   : > { %p1132_p0 = scmp.ne.s32.totalorder %s1431_s22, %s1131_s12  ;;  %s1136_s27 = sshll.u32 %s1274_s13, 4  ;;  %s1137_s27 = int_to_ptr.vmem [resolvable:$false] %s1136_s27 }
  0x2b   : > { %s1138_s16 = scalar_lea.vmem %s1137_s27, 2048  ;;  %p1139_p11 = scmp.lt.s32.totalorder %s1431_s22, %s1137_s27 }
  0x2c   : > { %p1134_p2 = pnand %p1132_p0, %p1118_p1  ;;  %p1140_p4 = scmp.lt.s32.totalorder %s1138_s16, %s1131_s12 }
  0x2e   : > { %p1135_p12 = pneg %p1134_p2  ;;  %p1141_p5 = por %p1140_p4, %p1139_p11 }
  0x30   : > { %p1142_p7 = pnand %p1141_p5, %p1135_p12 }
  0x32   : > { %1145 = shalt.err (!%p1142_p7)
}
  0x33   : > { %s1275_s15 = smov 128   ;;  %s1276_s14 = smov 8  }
  0x34   : > { %1033 = dma.hbm_to_vmem [thread:$0]  (!%p1427_p13), %s1423_s24, 1024, %s1431_s22, %s1433_s19, %s1275_s15, %s1275_s15, %s1276_s14  }
  0x35   : > { %p983_p9 = scmp.ge.s32.totalorder %s1272_s20, 1  ;;  %p372_p1 = scmp.lt.s32.totalorder %s1272_s20, 3 }
  0x37   : > { %p373_p3 = pnand %p983_p9, %p372_p1 }
  0x38   : > { %s1464_s25 = sand.u32 (!%p373_p3), 1, %s1264_s18  }
  0x39   : > { %376 = sbr.rel (%p373_p3) target bundleno = 689 (0x2b1), region = 56  ;;  %s984_s12 = sshll.u32 (!%p373_p3), %s1464_s25, 6 }
  0x3a   : > { %s379_s13 = scalar_lea.sflag (!%p373_p3), [#allocation3], %s1464_s25  ;;  %s1468_s27 = scalar_lea.vmem (!%p373_p3), [#allocation2], %s984_s12 }
  0x40   : > { %1247 = dma.done.wait (%p1401_p6), %s379_s13, 1024  }
  0x41   : > { %1249 = vsyncadd (%p1401_p6), %s379_s13, 4294966272  ;;  %p432_p11 = scmp.lt.s32.totalorder %s1379_s21, 1  ;;  %v1277_v0 = vmov 0.0   ;;  %vm1278_vm0 = vmmov 0   ;;  %s1652_s0 = sld [smem:[#allocation14_spill]]  ;;  %vm443_vm1 = vcmask 1043456   ;;  %v673_v47 = vlaneseq }
  0x42   : > { %1012 = vmatprep.subr.mxu1 %v1277_v0  ;;  %1014 = vmatprep.mubr.msk.f32.mxu1 %vm1278_vm0, %v1277_v0  ;;  %vm439_vm2 = vcmask 31744   ;;  %v437_v1 = vld [vmem:[%s1628_s2] sm:$0xf]  ;;  %vm793_vm3 = vcmask 24576   ;;  %s1641_s26 = scalar_lea.vmem [#allocation8], %s1464_s25  ;;  %s1279_s16 = smov 12  }
  0x43   : > { %s433_s19 = scalar_select %p432_p11, %s1379_s21, 1  ;;  %v518_v3 = vld [vmem:[%s1630_s4] sm:$0xf]  ;;  %1013 = vmatpush3.msk.msra.mxu1 %vm443_vm1, %v437_v1  ;;  %v1100_v17 = vld [vmem:[%s1468_s27 + $0x4] ss:$8 sps:$4 sm:$0xff]   ;;  %v1291_v25 = vmov 0  }
  0x44   : > { %1017 = vmatprep.subr.mxu1 %v1277_v0  ;;  %v438_v4 = vld [vmem:[%s1629_s3] sm:$0x1]  ;;  %s1280_s15 = smov 4   ;;  %s1281_s28 = smov 16   ;;  %731 = vmatprep.subr.bf16.mxu0 %v1100_v17  ;;  %v1103_v19 = vld [vmem:[%s1468_s27 + $0x14] ss:$8 sps:$4 sm:$0xff]  }
  0x45   : > { %v519_v8 = vld [vmem:[%s1631_s5] sm:$0x1]  ;;  %s1282_s14 = smov 8   ;;  %s1283_s12 = smov 24   ;;  %v1105_v20 = vld [vmem:[%s1468_s27 + $0x10] ss:$8 sps:$4 sm:$0xff]   ;;  %763 = vmatprep.mubr.bf16.mxu0 %v1291_v25  ;;  %1098 = vset.pattern.permute.xlu1 %v1291_v25 }
  0x46   : > { %v1102_v18 = vld [vmem:[%s1468_s27] ss:$8 sps:$4 sm:$0xff]   ;;  %s1284_s13 = smov 20   ;;  %v1106_v21 = vld [vmem:[%s1468_s27 + $0x24] ss:$8 sps:$4 sm:$0xff]   ;;  %s1286_s22 = smov 28   ;;  %1099 = vset.pattern.permute.xlu0 %v1291_v25 }
  0x47   : > { %s434_s24 = scalar_lea.vmem %s1652_s0, %s433_s19  ;;  %732 = vmatpush1.bf16.msra.mxu0 %v1102_v18  ;;  %s1285_s19 = smov 32   ;;  %v1108_v22 = vld [vmem:[%s1468_s27 + $0x20] ss:$8 sps:$4 sm:$0xff]   ;;  %v1109_v23 = vld [vmem:[%s1468_s27 + $0x34] ss:$8 sps:$4 sm:$0xff]   ;;  %vm644_vm4 = vcmask 64512  }
  0x48   : > { %v436_v2 = vld [vmem:[%s434_s24] sm:$0x1]  ;;  %s425_s24 = scalar_lea.vmem [#allocation6], %s1464_s25  ;;  %733 = vmatprep.subr.bf16.mxu0 %v1103_v19  ;;  %v1111_v24 = vld [vmem:[%s1468_s27 + $0x30] ss:$8 sps:$4 sm:$0xff]   ;;  %vm646_vm5 = vcmask 97280  }
  0x49   : > { %1015 = vmatmul.mubr.msk.f32.vlgmr.msra.gmra.mrb[0].mxu1 %vm439_vm2, %v436_v2  ;;  %v772_v26 = vld [vmem:[%s1633_s7] sm:$0xff]  ;;  %vm648_vm6 = vcmask 130048   ;;  %vm650_vm7 = vcmask 162816   ;;  %vm652_vm8 = vcmask 195584   ;;  %vm654_vm9 = vcmask 228352   ;;  %s832_s27 = sshll.u32 %s425_s24, 4  ;;  %s833_s27 = int_to_ptr.vmem [resolvable:$true] %s832_s27 }
  0x4a   : > { %1018 = vmatpush3.msk.msra.mxu1 %vm443_vm1, %v518_v3  ;;  %1019 = vmatprep.mubr.msk.f32.mxu1 %vm1278_vm0, %v1277_v0  ;;  %v780_v27 = vld [vmem:[%s1634_s8] sm:$0xff]  ;;  %vm656_vm10 = vcmask 261120   ;;  %vm658_vm11 = vcmask 293888   ;;  %vm660_vm12 = vcmask 326656   ;;  %vm662_vm13 = vcmask 359424   ;;  %p1653_p12 = scmp.ne.s32.totalorder %s1648_s29, 0 }
  0x4b   : > { %734 = vmatpush1.bf16.msra.mxu0 %v1105_v20  ;;  %vm664_vm14 = vcmask 392192   ;;  %vm666_vm15 = vcmask 424960   ;;  %v674_v52 = vshrl.u32 %v673_v47, 7  ;;  %vm668_vm0 = vcmask 457728   ;;  %v672_v60 = vld [vmem:[%s1632_s6] sm:$0xff] }
  0x4c   : > { %735 = vmatprep.subr.bf16.mxu0 %v1106_v21  ;;  %vm670_vm1 = vcmask 490496  }
  0x4d   : > { %1020 = vmatmul.mubr.msk.f32.vlgmr.msra.gmra.mrb[2].mxu1 %vm439_vm2, %v436_v2  ;;  %v675_v57 = vsub.s32 0, %v674_v52 }
  0x4f   : > { %736 = vmatpush1.bf16.msra.mxu0 %v1108_v22 }
  0x50   : > { %737 = vmatprep.subr.bf16.mxu0 %v1109_v23 }
  0x53   : > { %738 = vmatpush1.bf16.msra.mxu0 %v1111_v24 }
 0x11c   : > { %v513_v5 = vpop.f32.mrb[0].mxu1 }
 0x11d   : > { %v514_v6 = vadd.f32 %v513_v5, %v438_v4  ;;  %v1016_v7 = vpop.f32.mrb[1].mxu1 }
 0x11f   : > { %1112 = vtanh.f32 %v514_v6 }
 0x120   : > { %v589_v9 = vpop.f32.mrb[2].mxu1 }
 0x121   : > { %v590_v10 = vadd.f32 %v589_v9, %v519_v8  ;;  %v1021_v11 = vpop.f32.mrb[3].mxu1 }
 0x123   : > { %1114 = vtanh.f32 %v590_v10 }
 0x129   : > { %v1113_v12 = vpop.eup %1112 }
 0x12a   : > { %795 = vst.msk [vmem:[%s1641_s26] sm:$0x1] %vm793_vm3, %v1113_v12  ;;  %v594_v13 = vmul.f32 0.1, %v1113_v12 }
 0x12d   : > { %v1115_v14 = vpop.eup %1114 }
 0x12e   : > { %v595_v15 = vadd.f32 %v1115_v14, %v594_v13  ;;  %794 = vst.msk [vmem:[%s425_s24] sm:$0x1] %vm793_vm3, %v1115_v14 }
 0x130   : > { %v596_v16 = vadd.f32 1.0, %v595_v15 }
 0x132   : > { %604 = vrot.lane.b32.xlu1 %v596_v16, %s1279_s16  ;;  %598 = vrot.lane.b32.xlu0 %v596_v16, %s1280_s15  ;;  %s1287_s16 = smov 40   ;;  %s1288_s15 = smov 36  }
 0x136   : > { %607 = vrot.lane.b32.xlu1 %v596_v16, %s1281_s28  ;;  %601 = vrot.lane.b32.xlu0 %v596_v16, %s1282_s14  ;;  %s1289_s28 = smov 48   ;;  %s1290_s14 = smov 44  }
 0x13a   : > { %613 = vrot.lane.b32.xlu1 %v596_v16, %s1283_s12  ;;  %610 = vrot.lane.b32.xlu0 %v596_v16, %s1284_s13  ;;  %s1292_s12 = smov 56   ;;  %s1293_s13 = smov 52  }
 0x13e   : > { %619 = vrot.lane.b32.xlu1 %v596_v16, %s1285_s19  ;;  %616 = vrot.lane.b32.xlu0 %v596_v16, %s1286_s22 }
 0x142   : > { %625 = vrot.lane.b32.xlu1 %v596_v16, %s1287_s16  ;;  %622 = vrot.lane.b32.xlu0 %v596_v16, %s1288_s15  ;;  %s1294_s16 = smov 60  }
 0x146   : > { %631 = vrot.lane.b32.xlu1 %v596_v16, %s1289_s28  ;;  %628 = vrot.lane.b32.xlu0 %v596_v16, %s1290_s14  ;;  %s1146_s28 = scalar_lea.vmem %s833_s27, 16  ;;  %s1295_s14 = smov [#allocation6]  }
 0x147   : > { %p1147_p6 = scmp.ne.s32.totalorder %s833_s27, %s1146_s28  ;;  %s1150_s26 = sshll.u32 %s1295_s14, 4  ;;  %s1151_s26 = int_to_ptr.vmem [resolvable:$false] %s1150_s26 }
 0x148   : > { %s1152_s0 = scalar_lea.vmem %s1151_s26, 32  ;;  %p1153_p10 = scmp.lt.s32.totalorder %s833_s27, %s1151_s26 }
 0x149   : > { %p1148_p13 = pnand %p1147_p6, %p1653_p12  ;;  %p1154_p0 = scmp.lt.s32.totalorder %s1152_s0, %s1146_s28 }
 0x14a   : > { %637 = vrot.lane.b32.xlu1 %v596_v16, %s1292_s12  ;;  %634 = vrot.lane.b32.xlu0 %v596_v16, %s1293_s13  ;;  %s801_s12 = sand.u32 1, %s1379_s21   ;;  %s1002_s13 = sshll.u32 %s1379_s21, 4 }
 0x14b   : > { %s1528_s15 = scalar_lea.sflag [#allocation7], %s801_s12  ;;  %p1149_p8 = pneg %p1148_p13 }
 0x14c   : > { %p1155_p2 = por %p1154_p0, %p1153_p10 }
 0x14e   : > { %640 = vrot.lane.b32.xlu0 %v596_v16, %s1294_s16  ;;  %775 = vperm.xlu1 %1098, %v772_v26   ;;  %s1524_s16 = scalar_lea.hbm %s1636_s10, %s1002_s13  ;;  %p1156_p4 = pnand %p1155_p2, %p1149_p8 }
 0x152   : > { %783 = vperm.xlu0 %1099, %v780_v27  }
 0x1a4   : > { %v605_v28 = vpop.permute.xlu1 %604  ;;  %v599_v29 = vpop.permute.xlu0 %598 }
 0x1a5   : > { %v643_v30 = vsel %vm439_vm2, %v596_v16, %v599_v29  ;;  %vm727_vm2 = vcmask 523264  }
 0x1a8   : > { %v608_v31 = vpop.permute.xlu1 %607  ;;  %v602_v32 = vpop.permute.xlu0 %601 }
 0x1a9   : > { %v645_v33 = vsel %vm644_vm4, %v643_v30, %v602_v32 }
 0x1aa   : > { %v647_v34 = vsel %vm646_vm5, %v645_v33, %v605_v28 }
 0x1ab   : > { %v649_v35 = vsel %vm648_vm6, %v647_v34, %v608_v31 }
 0x1ac   : > { %v614_v36 = vpop.permute.xlu1 %613  ;;  %v611_v37 = vpop.permute.xlu0 %610 }
 0x1ad   : > { %v651_v38 = vsel %vm650_vm7, %v649_v35, %v611_v37 }
 0x1ae   : > { %v653_v40 = vsel %vm652_vm8, %v651_v38, %v614_v36 }
 0x1b0   : > { %v620_v39 = vpop.permute.xlu1 %619  ;;  %v617_v41 = vpop.permute.xlu0 %616 }
 0x1b1   : > { %v655_v42 = vsel %vm654_vm9, %v653_v40, %v617_v41 }
 0x1b2   : > { %v657_v44 = vsel %vm656_vm10, %v655_v42, %v620_v39 }
 0x1b4   : > { %v626_v43 = vpop.permute.xlu1 %625  ;;  %v623_v45 = vpop.permute.xlu0 %622 }
 0x1b5   : > { %v659_v46 = vsel %vm658_vm11, %v657_v44, %v623_v45 }
 0x1b6   : > { %v661_v49 = vsel %vm660_vm12, %v659_v46, %v626_v43 }
 0x1b8   : > { %v632_v48 = vpop.permute.xlu1 %631  ;;  %v629_v50 = vpop.permute.xlu0 %628 }
 0x1b9   : > { %v663_v51 = vsel %vm662_vm13, %v661_v49, %v629_v50 }
 0x1ba   : > { %v665_v53 = vsel %vm664_vm14, %v663_v51, %v632_v48 }
 0x1bc   : > { %v635_v54 = vpop.permute.xlu0 %634  ;;  %v638_v55 = vpop.permute.xlu1 %637 }
 0x1bd   : > { %v667_v56 = vsel %vm666_vm15, %v665_v53, %v635_v54 }
 0x1be   : > { %v669_v58 = vsel %vm668_vm0, %v667_v56, %v638_v55 }
 0x1c0   : > { %v641_v59 = vpop.permute.xlu0 %640 }
 0x1c1   : > { %v671_v61 = vsel %vm670_vm1, %v669_v58, %v641_v59 }
 0x1c2   : > { %v676_v62 = vrot.slane %v671_v61, %v675_v57 }
 0x1c4   : > { %v677_v63 = vmul.f32 %v676_v62, %v672_v60 }
 0x1c6   : > { %v678_v0 = vpack.c.bf16 %v677_v63, %v677_v63 }
 0x1c8   : > { %998 = vmatmul.mubr.msk.bf16.vlgmr.msra.gmra.mrb[0].mxu0 %vm727_vm2, %v678_v0 }
 0x1c9   : > { %1159 = shalt.err (!%p1156_p4)
}
 0x1ca   : > { %s1160_s24 = scalar_lea.hbm %s1524_s16, 16  ;;  %s1164_s22 = scalar_lea.hbm %s1636_s10, 32 }
 0x1cb   : > { %p1161_p5 = scmp.ne.s32.totalorder %s1524_s16, %s1160_s24  ;;  %p1165_p1 = scmp.lt.u32.totalorder %s1524_s16, %s1636_s10 }
 0x1cc   : > { %p1166_p3 = scmp.lt.u32.totalorder %s1164_s22, %s1160_s24  ;;  %p1168_p6 = scmp.lt.u32.totalorder %s1160_s24, %s1524_s16 }
 0x1cd   : > { %p1162_p7 = pnand %p1161_p5, %p1653_p12 }
 0x1ce   : > { %p1167_p11 = por %p1166_p3, %p1165_p1 }
 0x1cf   : > { %p1163_p9 = pneg %p1162_p7 }
 0x1d0   : > { %p1169_p13 = por %p1168_p6, %p1167_p11 }
 0x1d2   : > { %p1170_p8 = pnand %p1169_p13, %p1163_p9 }
 0x1d4   : > { %1173 = shalt.err (!%p1170_p8)
}
 0x1d5   : > { %1025 = dma.vmem_to_hbm [thread:$0]  (%p1653_p12), %s833_s27, 16, %s1524_s16, %s1528_s15  }
 0x1d6   : > { %s1553_s12 = scalar_lea.hbm %s1637_s11, %s1002_s13  ;;  %s1654_s19 = scalar_lea.vmem [#allocation8], %s1464_s25 }
 0x1d7   : > { %s845_s22 = sshll.u32 %s1654_s19, 4  ;;  %s1296_s14 = smov [#allocation8]   ;;  %s846_s22 = int_to_ptr.vmem [resolvable:$true] %s845_s22 }
 0x1d8   : > { %s1174_s24 = scalar_lea.vmem %s846_s22, 16  ;;  %s1178_s26 = sshll.u32 %s1296_s14, 4  ;;  %s1179_s26 = int_to_ptr.vmem [resolvable:$false] %s1178_s26 }
 0x1d9   : > { %p1175_p10 = scmp.ne.s32.totalorder %s846_s22, %s1174_s24  ;;  %s1180_s1 = scalar_lea.vmem %s1179_s26, 32 }
 0x1da   : > { %p1181_p4 = scmp.lt.s32.totalorder %s846_s22, %s1179_s26  ;;  %p1182_p5 = scmp.lt.s32.totalorder %s1180_s1, %s1174_s24 }
 0x1db   : > { %p1176_p0 = pnand %p1175_p10, %p1653_p12 }
 0x1dc   : > { %p1183_p7 = por %p1182_p5, %p1181_p4 }
 0x1dd   : > { %p1177_p2 = pneg %p1176_p0 }
 0x1df   : > { %p1184_p9 = pnand %p1183_p7, %p1177_p2 }
 0x1e1   : > { %1187 = shalt.err (!%p1184_p9)
}
 0x1e2   : > { %s1188_s13 = scalar_lea.hbm %s1553_s12, 16  ;;  %s1192_s0 = scalar_lea.hbm %s1637_s11, 32 }
 0x1e3   : > { %p1189_p1 = scmp.ne.s32.totalorder %s1553_s12, %s1188_s13  ;;  %p1193_p6 = scmp.lt.u32.totalorder %s1553_s12, %s1637_s11 }
 0x1e4   : > { %p1194_p13 = scmp.lt.u32.totalorder %s1192_s0, %s1188_s13  ;;  %p1196_p10 = scmp.lt.u32.totalorder %s1188_s13, %s1553_s12 }
 0x1e5   : > { %p1190_p3 = pnand %p1189_p1, %p1653_p12 }
 0x1e6   : > { %p1195_p8 = por %p1194_p13, %p1193_p6 }
 0x1e7   : > { %p1191_p11 = pneg %p1190_p3 }
 0x1e8   : > { %p1197_p0 = por %p1196_p10, %p1195_p8 }
 0x1ea   : > { %p1198_p2 = pnand %p1197_p0, %p1191_p11 }
 0x1ec   : > { %1201 = shalt.err (!%p1198_p2)
}
 0x1ed   : > { %1026 = dma.vmem_to_hbm [thread:$0]  (%p1653_p12), %s846_s22, 16, %s1553_s12, %s1528_s15   ;;  %v776_v1 = vpop.permute.xlu1 %775  ;;  %v784_v3 = vpop.permute.xlu0 %783  ;;  %vm791_vm3 = vcmask 334848  }
 0x1ee   : > { %s985_s1 = sshll.u32 %s1464_s25, 4  ;;  %s1007_s24 = sshll.u32 %s1379_s21, 8 }
 0x1ef   : > { %s419_s14 = scalar_lea.vmem [#allocation5], %s985_s1  ;;  %s1580_s22 = scalar_lea.hbm %s1635_s9, %s1007_s24 }
 0x1f0   : > { %s819_s26 = sshll.u32 %s419_s14, 4  ;;  %s797_s13 = scalar_lea.sflag [#allocation4], %s1464_s25  ;;  %s1582_s26 = int_to_ptr.vmem [resolvable:$true] %s819_s26 }
 0x1f1   : > { %s1202_s21 = scalar_lea.vmem %s1582_s26, 256  ;;  %s1297_s16 = smov [#allocation5]  }
 0x1f2   : > { %p1203_p4 = scmp.ne.s32.totalorder %s1582_s26, %s1202_s21  ;;  %s1206_s27 = sshll.u32 %s1297_s16, 4  ;;  %s1207_s27 = int_to_ptr.vmem [resolvable:$false] %s1206_s27 }
 0x1f3   : > { %s1208_s0 = scalar_lea.vmem %s1207_s27, 512  ;;  %p1209_p9 = scmp.lt.s32.totalorder %s1582_s26, %s1207_s27 }
 0x1f4   : > { %p1204_p5 = pnand %p1203_p4, %p1653_p12  ;;  %p1210_p1 = scmp.lt.s32.totalorder %s1208_s0, %s1202_s21 }
 0x1f6   : > { %p1205_p7 = pneg %p1204_p5  ;;  %p1211_p3 = por %p1210_p1, %p1209_p9 }
 0x1f8   : > { %p1212_p11 = pnand %p1211_p3, %p1205_p7 }
 0x29b   : > { %v765_v2 = vpop.f32.mrb[0].mxu0 }
 0x29c   : > { %v778_v4 = vmul.f32 %v776_v1, %v765_v2  ;;  %v767_v5 = vpop.f32.mrb[1].mxu0 }
 0x29d   : > { %v779_v6 = vmul.f32 %v776_v1, %v767_v5  ;;  %v769_v7 = vpop.f32.mrb[2].mxu0 }
 0x29e   : > { %v786_v8 = vadd.f32 %v784_v3, %v778_v4  ;;  %v770_v9 = vpop.f32.mrb[3].mxu0 }
 0x29f   : > { %v787_v10 = vadd.f32 %v784_v3, %v779_v6 }
 0x2a0   : > { %v788_v11 = vmax.f32 %v786_v8, 0.0 }
 0x2a1   : > { %v789_v12 = vmax.f32 %v787_v10, 0.0 }
 0x2a2   : > { %790 = vst [vmem:[%s419_s14] sm:$0xff] %v788_v11 }
 0x2a3   : > { %792 = vst.msk [vmem:[%s419_s14 + $0x8] sm:$0xff] %vm791_vm3, %v789_v12 }
 0x2a4   : > { %1215 = shalt.err (!%p1212_p11)
}
 0x2a5   : > { %s1216_s25 = scalar_lea.hbm %s1580_s22, 256  ;;  %s1220_s1 = scalar_lea.hbm %s1635_s9, 512 }
 0x2a6   : > { %p1217_p6 = scmp.ne.s32.totalorder %s1580_s22, %s1216_s25  ;;  %p1221_p10 = scmp.lt.u32.totalorder %s1580_s22, %s1635_s9 }
 0x2a7   : > { %p1222_p0 = scmp.lt.u32.totalorder %s1220_s1, %s1216_s25  ;;  %p1224_p4 = scmp.lt.u32.totalorder %s1216_s25, %s1580_s22 }
 0x2a8   : > { %p1218_p13 = pnand %p1217_p6, %p1653_p12 }
 0x2a9   : > { %p1223_p2 = por %p1222_p0, %p1221_p10 }
 0x2aa   : > { %p1219_p8 = pneg %p1218_p13 }
 0x2ab   : > { %p1225_p5 = por %p1224_p4, %p1223_p2 }
 0x2ad   : > { %p1226_p7 = pnand %p1225_p5, %p1219_p8 }
 0x2af   : > { %1229 = shalt.err (!%p1226_p7)
}
 0x2b0   : > { %1024 = dma.vmem_to_hbm [thread:$0]  (%p1653_p12), %s1582_s26, 256, %s1580_s22, %s797_s13  }
 0x2b1 PF: > { %s857_s15 = sand.u32 1, %s1260_s17   ;;  %p1655_p9 = scmp.ne.s32.totalorder %s1649_s30, 0 }
 0x2b2   : > { %p1656_p1 = scmp.ge.s32.totalorder %s1272_s20, 2  ;;  %s858_s12 = scalar_lea.sflag [#allocation4], %s857_s15 }
 0x2b4   : > { %p1035_p3 = pnand %p1656_p1, %p1655_p9 }
 0x2b6   : > { %1251 = dma.done.wait (!%p1035_p3), %s858_s12, 256  }
 0x2b7   : > { %1253 = vsyncadd (!%p1035_p3), %s858_s12, 4294967040  ;;  %s1657_s21 = sadd.s32 4294967294, %s1272_s20  }
 0x2b8   : > { %s866_s16 = sand.u32 1, %s1657_s21  }
 0x2b9   : > { %s867_s27 = scalar_lea.sflag [#allocation7], %s866_s16 }
 0x2ba   : > { %1255 = dma.done.wait (!%p1035_p3), %s867_s27, 32  }
 0x2bb   : > { %1257 = vsyncadd (!%p1035_p3), %s867_s27, 4294967264  ;;  %s1658_s29 = sld [smem:[#allocation12_spill]]  ;;  %s1659_s19 = sld [smem:[#allocation13_spill]] }
 0x2bc   : > { %p28_p12 = scmp.ge.s32.totalorder %s1383_s23, 4   ;;  %s1660_s17 = smov %s1264_s18 }
 0x2bd   : > { %s1662_s20 = smov %s1383_s23 }
 0x2be   :  { %30 = sbr.rel (!%p28_p12) target bundleno = 10 (0xa), region = 136 }
 0x2c1   : > { %s1661_s18 = smov %s1658_s29 }
 0x2c5   :  { %879 = vsyncpa [#allocation3], 1 }
 0x2c6   :  { %881 = vsyncpa [#allocation3 + $0x1], 1 }
 0x2c7   :  { %882 = vsyncpa [#allocation4], 1 }
 0x2c8   :  { %884 = vsyncpa [#allocation4 + $0x1], 1 }
 0x2c9   :  { %885 = vsyncpa [#allocation7], 1 }
 0x2ca   :  { %887 = vsyncpa [#allocation7 + $0x1], 1 }

</bundles_post_ra>
